<compile_context>
chip_gen: v7x
topology: tpu7x:2x2x1
jax: 0.10.0
libtpu: 0.0.40
codegen_flags: <defaults>
</compile_context>

<pallas_src>
import functools

import jax
import jax.numpy as jnp
from jax.experimental import pallas as pl
from jax.experimental.pallas import tpu as pltpu


def _round_up(x, m):
    return ((x + m - 1) // m) * m


def _vmem_capacity_bytes():
    try:
        return int(pltpu.get_tpu_info().vmem_capacity_bytes)
    except Exception:
        return 64 * 1024 * 1024  # conservative fallback (v7x per-TC VMEM)


# --------------------------------------------------------------------------- kernel
def prediction_model_kernel(x_ref, wf_ref, bf_ref, w2_ref, b2_ref, out_ref, acc_ref):
    k = pl.program_id(1)

    @pl.when(k == 0)
    def _():
        acc_ref[...] = jnp.zeros_like(acc_ref)

    # Fused (encoder ∘ pred_head[0]) partial matmul over the K (in_feat) axis, f32 accumulation.
    acc_ref[...] += jnp.dot(x_ref[...], wf_ref[...], preferred_element_type=jnp.float32)

    @pl.when(k == pl.num_programs(1) - 1)
    def _():
        h = jnp.maximum(acc_ref[...] + bf_ref[...], 0.0)       # bias + ReLU(inplace=True), f32
        out = jnp.dot(h.astype(w2_ref.dtype), w2_ref[...],
                      preferred_element_type=jnp.float32) + b2_ref[...]
        out_ref[...] = out.astype(out_ref.dtype)


# --------------------------------------------------------------------------- host-side prep (once)
def prepare_params(params):
    """Fold encoder into pred_head[0], zero-pad all dims to 128, cast weights to bf16. Run once."""
    we, be, w1, b1, w2, b2 = params
    in_feat = we.shape[0]
    hid = w1.shape[1]
    out_dim = w2.shape[1]

    in_feat_pad = _round_up(in_feat, 128)
    hid_pad = _round_up(hid, 128)
    out_pad = _round_up(out_dim, 128)

    # Exact f32 algebra: relu((x@We + be)@W1 + b1) == relu(x@(We@W1) + (be@W1 + b1))
    wf = we @ w1                                   # (in_feat, hid) f32
    bf = be @ w1 + b1                              # (1, hid)      f32

    wf_p = jnp.zeros((in_feat_pad, hid_pad), jnp.float32).at[:in_feat, :hid].set(wf)
    bf_p = jnp.zeros((1, hid_pad), jnp.float32).at[:, :hid].set(bf)
    w2_p = jnp.zeros((hid_pad, out_pad), jnp.float32).at[:hid, :out_dim].set(w2)
    b2_p = jnp.zeros((1, out_pad), jnp.float32).at[:, :out_dim].set(b2)

    arrays = dict(
        wf=wf_p.astype(jnp.bfloat16),   # streamed on MXU in bf16
        bf=bf_p,                        # biases stay f32 (VPU add in f32 on all generations)
        w2=w2_p.astype(jnp.bfloat16),
        b2=b2_p,
    )
    meta = dict(in_feat=in_feat, out_dim=out_dim,
                in_feat_pad=in_feat_pad, hid_pad=hid_pad, out_pad=out_pad)
    return arrays, meta


def _pick_tiles(B, in_feat_pad, hid_pad, out_pad, vmem_cap, tb_max, tk_max):
    """Pick (TB, TK) so double-buffered tiles + resident weights + scratch fit the chip's VMEM."""
    budget = int(vmem_cap * 0.7)
    TK = _round_up(min(in_feat_pad, tk_max), 128)
    TB = min(tb_max, _round_up(B, 16))              # 16-row alignment for bf16 sublane packing
    if TB >= 32:
        # >=2 batch tiles so both TensorCores get work on v7x (near-free on 1-TC chips).
        TB = min(TB, _round_up(pl.cdiv(_round_up(B, 16), 2), 16))

    def cost(tb, tk):
        nk = pl.cdiv(in_feat_pad, tk)
        wf_bufs = 1 if nk == 1 else 2
        return (2 * tb * tk * 2                     # x, double-buffered bf16
                + wf_bufs * tk * hid_pad * 2        # folded first-layer weights
                + hid_pad * 4                       # bf (single buffer)
                + hid_pad * out_pad * 2             # W2 (single buffer)
                + out_pad * 4                       # b2 (single buffer)
                + 2 * tb * out_pad * 4              # f32 output, double-buffered
                + tb * hid_pad * 4                  # acc scratch
                + tb * hid_pad * 4)                 # f32 `h` intermediate headroom

    while cost(TB, TK) > budget and TK > 128:       # prefer deeper K pipeline over smaller batch
        TK = max(128, _round_up(TK // 2, 128))
    while cost(TB, TK) > budget and TB > 16:
        TB = max(16, _round_up(TB // 2, 16))
    return TB, TK


# --------------------------------------------------------------------------- forward (jit'ed)
@functools.partial(jax.jit, static_argnames=("out_dim", "tb_max", "tk_max"))
def prediction_model_forward(x, arrays, *, out_dim, tb_max=None, tk_max=2048):
    """x: (B, in_feat) float32. arrays: output of prepare_params. Returns (B, out_dim) float32."""
    wf, bf, w2, b2 = arrays["wf"], arrays["bf"], arrays["w2"], arrays["b2"]
    B, in_feat = x.shape
    in_feat_pad, hid_pad = wf.shape
    out_pad = w2.shape[1]

    vmem_cap = _vmem_capacity_bytes()
    if tb_max is None:
        # 128 MiB chips (v5e/v6e) can afford bigger batch tiles than 64 MiB v7x.
        tb_max = 2048 if vmem_cap >= 96 * 1024 * 1024 else 1024
    TB, TK = _pick_tiles(B, in_feat_pad, hid_pad, out_pad, vmem_cap, tb_max, tk_max)

    B_pad = _round_up(B, TB)
    x_bf = x.astype(jnp.bfloat16)
    if B_pad != B or in_feat_pad != in_feat:
        x_bf = jnp.pad(x_bf, ((0, B_pad - B), (0, in_feat_pad - in_feat)))

    nb, nk = B_pad // TB, in_feat_pad // TK
    resident = pl.Buffered(1)                      # constant-index operands: single VMEM buffer
    wf_mode = pl.Buffered(1) if nk == 1 else None  # Wf re-fetched per K step only when tiled over K

    cost = pl.CostEstimate(
        flops=2 * B_pad * in_feat_pad * hid_pad + 2 * B_pad * hid_pad * out_pad,
        transcendentals=0,
        bytes_accessed=(x_bf.size * 2 + wf.size * 2 + w2.size * 2
                        + bf.size * 4 + b2.size * 4 + B_pad * out_pad * 4),
    )

    out_padded = pl.pallas_call(
        prediction_model_kernel,
        out_shape=jax.ShapeDtypeStruct((B_pad, out_pad), jnp.float32),
        grid=(nb, nk),
        in_specs=[
            pl.BlockSpec((TB, TK), lambda i, k: (i, k)),                               # x
            pl.BlockSpec((TK, hid_pad), lambda i, k: (k, 0), pipeline_mode=wf_mode),   # Wf
            pl.BlockSpec((1, hid_pad), lambda i, k: (0, 0), pipeline_mode=resident),   # bf
            pl.BlockSpec((hid_pad, out_pad), lambda i, k: (0, 0), pipeline_mode=resident),  # W2
            pl.BlockSpec((1, out_pad), lambda i, k: (0, 0), pipeline_mode=resident),   # b2
        ],
        out_specs=pl.BlockSpec((TB, out_pad), lambda i, k: (i, 0)),
        scratch_shapes=[pltpu.VMEM((TB, hid_pad), jnp.float32)],                       # acc
        compiler_params=pltpu.CompilerParams(
            dimension_semantics=("parallel", "arbitrary"),
            vmem_limit_bytes=min(int(vmem_cap * 0.8), 100 * 1024 * 1024),
        ),
        cost_estimate=cost,
    )(x_bf, wf, bf, w2, b2)

    return out_padded[:B, :out_dim]


# --------------------------------------------------------------------------- reference / test
def init_params(key, in_feat, dim, out_dim):
    """Deterministic parameter init (uniform, like torch.nn.Linear default scale)."""
    ks = jax.random.split(key, 6)

    def lin(kw, kb, fan_in, fan_out):
        bound = 1.0 / jnp.sqrt(fan_in)
        w = jax.random.uniform(kw, (fan_in, fan_out), jnp.float32, -bound, bound)
        b = jax.random.uniform(kb, (1, fan_out), jnp.float32, -bound, bound)
        return w, b

    we, be = lin(ks[0], ks[1], in_feat, dim)        # encoder stand-in (Linear GNN readout)
    w1, b1 = lin(ks[2], ks[3], dim, dim // 2)       # pred_head[0]
    w2, b2 = lin(ks[4], ks[5], dim // 2, out_dim)   # pred_head[2]
    return we, be, w1, b1, w2, b2


def reference_forward(x, params):
    we, be, w1, b1, w2, b2 = params
    zg = x @ we + be
    h = jnp.maximum(zg @ w1 + b1, 0.0)
    return h @ w2 + b2


if __name__ == "__main__":
    key = jax.random.PRNGKey(0)
    k_x, k_p, k_x2, k_p2 = jax.random.split(key, 4)

    # --- small-shape check (single batch tile, single K tile) ---
    B, in_feat, dim, out_dim = 8, 16, 32, 8
    x = jax.random.normal(k_x, (B, in_feat), jnp.float32)
    params = init_params(k_p, in_feat, dim, out_dim)
    arrays, meta = prepare_params(params)

    out = prediction_model_forward(x, arrays, out_dim=meta["out_dim"])
    out = jax.block_until_ready(out)
    ref = reference_forward(x, params)
    assert out.shape == (B, out_dim)
    # bf16 weight/activation streaming (f32 accumulation) -> relaxed tolerance vs f32 reference.
    assert jnp.allclose(out, ref, atol=3e-2, rtol=3e-2), float(jnp.max(jnp.abs(out - ref)))

    # --- multi-tile check (2 batch tiles x 2 K tiles) to exercise the accumulator path ---
    B2, in_feat2, dim2, out_dim2 = 160, 200, 64, 10
    x2 = jax.random.normal(k_x2, (B2, in_feat2), jnp.float32)
    params2 = init_params(k_p2, in_feat2, dim2, out_dim2)
    arrays2, meta2 = prepare_params(params2)

    out2 = prediction_model_forward(x2, arrays2, out_dim=meta2["out_dim"],
                                    tb_max=96, tk_max=128)
    out2 = jax.block_until_ready(out2)
    ref2 = reference_forward(x2, params2)
    assert out2.shape == (B2, out_dim2)
    assert jnp.allclose(out2, ref2, atol=5e-2, rtol=5e-2), float(jnp.max(jnp.abs(out2 - ref2)))

    print("KERNEL_OK")
</pallas_src>

<mosaic_0001>
module attributes {stable_mosaic.version = 11 : i64} {
  func.func @prediction_model_kernel(%arg0: i32, %arg1: i32, %arg2: memref<16x128xbf16, #tpu.memory_space<vmem>>, %arg3: memref<128x128xbf16, #tpu.memory_space<vmem>>, %arg4: memref<1x128xf32, #tpu.memory_space<vmem>>, %arg5: memref<128x128xbf16, #tpu.memory_space<vmem>>, %arg6: memref<1x128xf32, #tpu.memory_space<vmem>>, %arg7: memref<16x128xf32, #tpu.memory_space<vmem>>, %arg8: memref<16x128xf32, #tpu.memory_space<vmem>>) attributes {dimension_semantics = [#tpu.dimension_semantics<parallel>, #tpu.dimension_semantics<arbitrary>], iteration_bounds = array<i64: 1, 1>, scalar_prefetch = 0 : i64, scratch_operands = 1 : i64, tpu.core_type = #tpu.core_type<tc>, window_params = [{transform_indices = @transform_0, window_bounds = array<i64: 16, 128>}, {pipeline_mode = #tpu.pipeline_mode<synchronous>, transform_indices = @transform_1, window_bounds = array<i64: 128, 128>}, {pipeline_mode = #tpu.pipeline_mode<synchronous>, transform_indices = @transform_2, window_bounds = array<i64: 1, 128>}, {pipeline_mode = #tpu.pipeline_mode<synchronous>, transform_indices = @transform_3, window_bounds = array<i64: 128, 128>}, {pipeline_mode = #tpu.pipeline_mode<synchronous>, transform_indices = @transform_4, window_bounds = array<i64: 1, 128>}, {transform_indices = @transform_5, window_bounds = array<i64: 16, 128>}]} {
    %c0_i32 = arith.constant 0 : i32
    %0 = arith.cmpi eq, %arg1, %c0_i32 : i32
    %1 = arith.extui %0 : i1 to i32
    %c0_i32_0 = arith.constant 0 : i32
    %2 = arith.cmpi ne, %1, %c0_i32_0 : i32
    scf.if %2 {
      %cst_10 = arith.constant 0.000000e+00 : f32
      %12 = vector.broadcast %cst_10 : f32 to vector<16x128xf32>
      %c0_11 = arith.constant 0 : index
      %c0_12 = arith.constant 0 : index
      %13 = vector.load %arg8[%c0_11, %c0_12] : memref<16x128xf32, #tpu.memory_space<vmem>>, vector<16x128xf32>
      tpu.vector_store %arg8[%c0_11, %c0_12], %12 {strides = array<i32>} : memref<16x128xf32, #tpu.memory_space<vmem>>, vector<16x128xf32>,
    } else {
    }
    %c0 = arith.constant 0 : index
    %c0_1 = arith.constant 0 : index
    %3 = vector.load %arg8[%c0, %c0_1] : memref<16x128xf32, #tpu.memory_space<vmem>>, vector<16x128xf32>
    %c0_2 = arith.constant 0 : index
    %c0_3 = arith.constant 0 : index
    %4 = vector.load %arg2[%c0_2, %c0_3] : memref<16x128xbf16, #tpu.memory_space<vmem>>, vector<16x128xbf16>
    %c0_4 = arith.constant 0 : index
    %c0_5 = arith.constant 0 : index
    %5 = vector.load %arg3[%c0_4, %c0_5] : memref<128x128xbf16, #tpu.memory_space<vmem>>, vector<128x128xbf16>
    %cst = arith.constant dense<0.000000e+00> : vector<16x128xf32>
    %6 = tpu.matmul %4, %5, %cst {dimension_numbers = #tpu.dot_dimension_numbers<[1], [0], [0], [1], [0, 0, 1, 1], [], []>} : vector<16x128xbf16>, vector<128x128xbf16>, vector<16x128xf32> -> vector<16x128xf32>
    %7 = arith.addf %3, %6 : vector<16x128xf32>
    %c0_6 = arith.constant 0 : index
    %c0_7 = arith.constant 0 : index
    %8 = vector.load %arg8[%c0_6, %c0_7] : memref<16x128xf32, #tpu.memory_space<vmem>>, vector<16x128xf32>
    tpu.vector_store %arg8[%c0_6, %c0_7], %7 {strides = array<i32>} : memref<16x128xf32, #tpu.memory_space<vmem>>, vector<16x128xf32>,
    %c0_i32_8 = arith.constant 0 : i32
    %9 = arith.cmpi eq, %arg1, %c0_i32_8 : i32
    %10 = arith.extui %9 : i1 to i32
    %c0_i32_9 = arith.constant 0 : i32
    %11 = arith.cmpi ne, %10, %c0_i32_9 : i32
    scf.if %11 {
      %c0_10 = arith.constant 0 : index
      %c0_11 = arith.constant 0 : index
      %12 = vector.load %arg8[%c0_10, %c0_11] : memref<16x128xf32, #tpu.memory_space<vmem>>, vector<16x128xf32>
      %c0_12 = arith.constant 0 : index
      %c0_13 = arith.constant 0 : index
      %13 = vector.load %arg4[%c0_12, %c0_13] : memref<1x128xf32, #tpu.memory_space<vmem>>, vector<1x128xf32>
      %14 = vector.broadcast %13 : vector<1x128xf32> to vector<16x128xf32>
      %15 = arith.addf %12, %14 : vector<16x128xf32>
      %cst_14 = arith.constant 0.000000e+00 : f32
      %16 = vector.broadcast %cst_14 : f32 to vector<16x128xf32>
      %17 = arith.maximumf %15, %16 : vector<16x128xf32>
      %18 = arith.truncf %17 : vector<16x128xf32> to vector<16x128xbf16>
      %c0_15 = arith.constant 0 : index
      %c0_16 = arith.constant 0 : index
      %19 = vector.load %arg5[%c0_15, %c0_16] : memref<128x128xbf16, #tpu.memory_space<vmem>>, vector<128x128xbf16>
      %cst_17 = arith.constant dense<0.000000e+00> : vector<16x128xf32>
      %20 = tpu.matmul %18, %19, %cst_17 {dimension_numbers = #tpu.dot_dimension_numbers<[1], [0], [0], [1], [0, 0, 1, 1], [], []>} : vector<16x128xbf16>, vector<128x128xbf16>, vector<16x128xf32> -> vector<16x128xf32>
      %c0_18 = arith.constant 0 : index
      %c0_19 = arith.constant 0 : index
      %21 = vector.load %arg6[%c0_18, %c0_19] : memref<1x128xf32, #tpu.memory_space<vmem>>, vector<1x128xf32>
      %22 = vector.broadcast %21 : vector<1x128xf32> to vector<16x128xf32>
      %23 = arith.addf %20, %22 : vector<16x128xf32>
      %c0_20 = arith.constant 0 : index
      %c0_21 = arith.constant 0 : index
      %24 = vector.load %arg7[%c0_20, %c0_21] : memref<16x128xf32, #tpu.memory_space<vmem>>, vector<16x128xf32>
      tpu.vector_store %arg7[%c0_20, %c0_21], %23 {strides = array<i32>} : memref<16x128xf32, #tpu.memory_space<vmem>>, vector<16x128xf32>,
    } else {
    }
    return
  }
  func.func @transform_0(%arg0: i32, %arg1: i32) -> (i32, i32) {
    %c0_i32 = arith.constant 0 : i32
    return %arg0, %arg1 : i32, i32
  }
  func.func @transform_1(%arg0: i32, %arg1: i32) -> (i32, i32) {
    %c0_i32 = arith.constant 0 : i32
    %c0_i32_0 = arith.constant 0 : i32
    return %arg1, %c0_i32 : i32, i32
  }
  func.func @transform_2(%arg0: i32, %arg1: i32) -> (i32, i32) {
    %c0_i32 = arith.constant 0 : i32
    %c0_i32_0 = arith.constant 0 : i32
    %c0_i32_1 = arith.constant 0 : i32
    return %c0_i32, %c0_i32_0 : i32, i32
  }
  func.func @transform_3(%arg0: i32, %arg1: i32) -> (i32, i32) {
    %c0_i32 = arith.constant 0 : i32
    %c0_i32_0 = arith.constant 0 : i32
    %c0_i32_1 = arith.constant 0 : i32
    return %c0_i32, %c0_i32_0 : i32, i32
  }
  func.func @transform_4(%arg0: i32, %arg1: i32) -> (i32, i32) {
    %c0_i32 = arith.constant 0 : i32
    %c0_i32_0 = arith.constant 0 : i32
    %c0_i32_1 = arith.constant 0 : i32
    return %c0_i32, %c0_i32_0 : i32, i32
  }
  func.func @transform_5(%arg0: i32, %arg1: i32) -> (i32, i32) {
    %c0_i32 = arith.constant 0 : i32
    %c0_i32_0 = arith.constant 0 : i32
    return %arg0, %c0_i32 : i32, i32
  }
}

</mosaic_0001>

<bundles_post_ra>
// kernel: prediction_model_forward.1
= control target key start
LH: loop header
LB: loop body
LE: loop exit
PB: predicated region body
PF: predicated region fallthrough
CT: control target
= control target key end

     0   :  { %10 = vsyncpa [#allocation4], 0  ;;  %s534_s0 = inlined_call_operand.vmem [shape: bf16[16,128], index: 0, kind: input, shape index: {}]   ;;  %s535_s1 = inlined_call_operand.hbm [shape: bf16[128,128], index: 1, kind: input, shape index: {}]   ;;  %s536_s2 = inlined_call_operand.vmem [shape: f32[1,128], index: 2, kind: input, shape index: {}]   ;;  %s537_s3 = inlined_call_operand.hbm [shape: bf16[128,128], index: 3, kind: input, shape index: {}]   ;;  %s538_s4 = inlined_call_operand.vmem [shape: f32[1,128], index: 4, kind: input, shape index: {}]   ;;  %s539_s5 = inlined_call_operand.vmem [shape: f32[16,128], index: 5, kind: output, shape index: {}]  }
   0x1   :  { %11 = vsyncpa [#allocation6], 0  ;;  %s459_s18 = smov [#allocation3]   ;;  %s411_s22 = scalar_lea.hbm %s535_s1, 1024 }
   0x2   :  { %s19_s19 = sshll.u32 %s459_s18, 4  ;;  %p412_p0 = scmp.ne.s32.totalorder %s535_s1, %s411_s22  ;;  %s20_s19 = int_to_ptr.vmem [resolvable:$true] %s19_s19 }
   0x3   :  { %p415_p1 = scmp.lt.u32.totalorder %s411_s22, %s535_s1 }
   0x5   :  { %p417_p2 = pnand %p415_p1, %p412_p0 }
   0x7   :  { %420 = shalt.err (!%p417_p2)
}
   0x8   :  { %s421_s27 = scalar_lea.vmem %s20_s19, 1024  ;;  %p426_p4 = scmp.lt.s32.totalorder %s20_s19, %s20_s19 }
   0x9   :  { %p422_p3 = scmp.ne.s32.totalorder %s20_s19, %s421_s27  ;;  %p427_p5 = scmp.lt.s32.totalorder %s421_s27, %s421_s27 }
   0xb   :  { %p428_p6 = por %p427_p5, %p426_p4 }
   0xd   :  { %p429_p7 = pnand %p428_p6, %p422_p3 }
   0xf   :  { %432 = shalt.err (!%p429_p7)
}
  0x10   :  { %s460_s28 = smov 64   ;;  %s461_s29 = smov 4  }
  0x11   :  { %25 = dma.hbm_to_vmem [thread:$0]  %s535_s1, 1024, %s20_s19, [#allocation4], %s460_s28, %s460_s28, %s461_s29  }
  0x12   :  { %s462_s7 = smov [#allocation5]   ;;  %s433_s11 = scalar_lea.hbm %s537_s3, 1024 }
  0x13   :  { %s33_s8 = sshll.u32 %s462_s7, 4  ;;  %p434_p8 = scmp.ne.s32.totalorder %s537_s3, %s433_s11  ;;  %s34_s8 = int_to_ptr.vmem [resolvable:$true] %s33_s8 }
  0x14   :  { %p437_p9 = scmp.lt.u32.totalorder %s433_s11, %s537_s3 }
  0x16   :  { %p439_p10 = pnand %p437_p9, %p434_p8 }
  0x18   :  { %442 = shalt.err (!%p439_p10)
}
  0x19   :  { %s443_s16 = scalar_lea.vmem %s34_s8, 1024  ;;  %p448_p12 = scmp.lt.s32.totalorder %s34_s8, %s34_s8 }
  0x1a   :  { %p444_p11 = scmp.ne.s32.totalorder %s34_s8, %s443_s16  ;;  %p449_p13 = scmp.lt.s32.totalorder %s443_s16, %s443_s16 }
  0x1c   :  { %p450_p0 = por %p449_p13, %p448_p12 }
  0x1e   :  { %p451_p1 = pnand %p450_p0, %p444_p11 }
  0x20   :  { %454 = shalt.err (!%p451_p1)
}
  0x21   :  { %39 = dma.hbm_to_vmem [thread:$0]  %s537_s3, 1024, %s34_s8, [#allocation6], %s460_s28, %s460_s28, %s461_s29  }
  0x22   :  { %455 = dma.done.wait [#allocation4], 1024  }
  0x23   :  { %456 = vsyncadd [#allocation4], 4294966272 }
  0x24   :  { %457 = dma.done.wait [#allocation6], 1024  }
  0x25   :  { %458 = vsyncadd [#allocation6], 4294966272  ;;  %v463_v0 = vmov 0.0   ;;  %vm464_vm0 = vmmov 0   ;;  %v394_v1 = vld [vmem:[#allocation3] sm:$0xff]   ;;  %v395_v2 = vld [vmem:[#allocation3 + $0x8] sm:$0xff]  }
  0x26   :  { %348 = vmatprep.subr.bf16.mxu0 %v463_v0  ;;  %364 = vmatprep.mubr.msk.bf16.mxu0 %vm464_vm0, %v463_v0  ;;  %v396_v3 = vld [vmem:[#allocation3 + $0x10] sm:$0xff]   ;;  %v403_v4 = vld [vmem:[#allocation5] sm:$0xff]   ;;  %v397_v5 = vld [vmem:[#allocation3 + $0x18] sm:$0xff]  }
  0x27   :  { %368 = vmatprep.subr.bf16.mxu1 %v463_v0  ;;  %384 = vmatprep.mubr.msk.bf16.mxu1 %vm464_vm0, %v463_v0  ;;  %v404_v6 = vld [vmem:[#allocation5 + $0x8] sm:$0xff]   ;;  %v398_v7 = vld [vmem:[#allocation3 + $0x20] sm:$0xff]   ;;  %v405_v8 = vld [vmem:[#allocation5 + $0x10] sm:$0xff]  }
  0x28   :  { %349 = vmatpush3.bf16.msra.mxu0 %v394_v1  ;;  %369 = vmatpush3.bf16.msra.mxu1 %v403_v4  ;;  %v399_v9 = vld [vmem:[#allocation3 + $0x28] sm:$0xff]   ;;  %v406_v10 = vld [vmem:[#allocation5 + $0x18] sm:$0xff]   ;;  %v400_v11 = vld [vmem:[#allocation3 + $0x30] sm:$0xff]  }
  0x29   :  { %350 = vmatprep.subr.bf16.mxu0 %v463_v0  ;;  %370 = vmatprep.subr.bf16.mxu1 %v463_v0  ;;  %v407_v12 = vld [vmem:[#allocation5 + $0x20] sm:$0xff]   ;;  %v401_v13 = vld [vmem:[#allocation3 + $0x38] sm:$0xff]   ;;  %v408_v14 = vld [vmem:[#allocation5 + $0x28] sm:$0xff]  }
  0x2a   :  { %v402_v15 = vld [vmem:[%s534_s0] sm:$0xff]   ;;  %v409_v16 = vld [vmem:[#allocation5 + $0x30] sm:$0xff]   ;;  %v410_v17 = vld [vmem:[#allocation5 + $0x38] sm:$0xff]  }
  0x2b   :  { %v320_v18 = vld [vmem:[%s536_s2] ss:$0 sm:$0xff] }
  0x2c   :  { %351 = vmatpush3.bf16.msra.mxu0 %v395_v2  ;;  %371 = vmatpush3.bf16.msra.mxu1 %v404_v6  ;;  %v321_v28 = vld [vmem:[%s538_s4] ss:$0 sm:$0xff] }
  0x2d   :  { %352 = vmatprep.subr.bf16.mxu0 %v463_v0  ;;  %372 = vmatprep.subr.bf16.mxu1 %v463_v0 }
  0x30   :  { %353 = vmatpush3.bf16.msra.mxu0 %v396_v3  ;;  %373 = vmatpush3.bf16.msra.mxu1 %v405_v8 }
  0x31   :  { %354 = vmatprep.subr.bf16.mxu0 %v463_v0  ;;  %374 = vmatprep.subr.bf16.mxu1 %v463_v0 }
  0x34   :  { %355 = vmatpush3.bf16.msra.mxu0 %v397_v5  ;;  %375 = vmatpush3.bf16.msra.mxu1 %v406_v10 }
  0x35   :  { %356 = vmatprep.subr.bf16.mxu0 %v463_v0  ;;  %376 = vmatprep.subr.bf16.mxu1 %v463_v0 }
  0x38   :  { %357 = vmatpush3.bf16.msra.mxu0 %v398_v7  ;;  %377 = vmatpush3.bf16.msra.mxu1 %v407_v12 }
  0x39   :  { %358 = vmatprep.subr.bf16.mxu0 %v463_v0  ;;  %378 = vmatprep.subr.bf16.mxu1 %v463_v0 }
  0x3c   :  { %359 = vmatpush3.bf16.msra.mxu0 %v399_v9  ;;  %379 = vmatpush3.bf16.msra.mxu1 %v408_v14 }
  0x3d   :  { %360 = vmatprep.subr.bf16.mxu0 %v463_v0  ;;  %380 = vmatprep.subr.bf16.mxu1 %v463_v0 }
  0x40   :  { %361 = vmatpush3.bf16.msra.mxu0 %v400_v11  ;;  %381 = vmatpush3.bf16.msra.mxu1 %v409_v16 }
  0x41   :  { %362 = vmatprep.subr.bf16.mxu0 %v463_v0  ;;  %382 = vmatprep.subr.bf16.mxu1 %v463_v0 }
  0x44   :  { %363 = vmatpush3.bf16.msra.mxu0 %v401_v13  ;;  %383 = vmatpush3.bf16.msra.mxu1 %v410_v17 }
  0x47   :  { %365 = vmatmul.mubr.bf16.vlgmr.msra.gmra.mrb[0].mxu0 %v402_v15 }
 0x11a   :  { %v163_v19 = vpop.f32.mrb[0].mxu0 }
 0x11b   :  { %v186_v20 = vadd.f32 %v320_v18, %v163_v19  ;;  %v366_v21 = vpop.f32.mrb[1].mxu0 }
 0x11c   :  { %v166_v22 = vpop.f32.mrb[2].mxu0 }
 0x11d   :  { %v187_v23 = vadd.f32 %v320_v18, %v166_v22  ;;  %v367_v24 = vpop.f32.mrb[3].mxu0  ;;  %v188_v25 = vmax.f32 %v186_v20, 0.0 }
 0x11f   :  { %v189_v26 = vmax.f32 %v187_v23, 0.0 }
 0x121   :  { %v190_v27 = vpack.c.bf16 %v189_v26, %v188_v25 }
 0x123   :  { %385 = vmatmul.mubr.bf16.vlgmr.msra.gmra.mrb[0].mxu1 %v190_v27 }
 0x1f6   :  { %v296_v29 = vpop.f32.mrb[0].mxu1 }
 0x1f7   :  { %v297_v30 = vadd.f32 %v321_v28, %v296_v29  ;;  %v386_v31 = vpop.f32.mrb[1].mxu1 }
 0x1f8   :  { %v299_v32 = vpop.f32.mrb[2].mxu1 }
 0x1f9   :  { %303 = vst [vmem:[%s539_s5] sm:$0xff] %v297_v30  ;;  %v300_v33 = vadd.f32 %v321_v28, %v299_v32  ;;  %v387_v34 = vpop.f32.mrb[3].mxu1 }
 0x1fb   :  { %304 = vst [vmem:[%s539_s5 + $0x8] sm:$0xff] %v300_v33 }
 0x1fc   :  { %309 = vsyncpa [#allocation4], 1 }
 0x1fd   :  { %310 = vsyncpa [#allocation6], 1 }

</bundles_post_ra>
